<compile_context>
chip_gen: v5e
topology: v5e:2x2
jax: 0.10.0
libtpu: 0.0.40
codegen_flags: <defaults>
</compile_context>

<pallas_src>
import functools

import jax
import jax.numpy as jnp
from jax.experimental import pallas as pl
from jax.experimental.pallas import tpu as pltpu


def embed_kernel(x_ref, wt_ref, add_ref, out_ref):
    # x_ref:   (1, S, D)  patches for one image; row 0 is zeros (class-token slot)
    # wt_ref:  (D, E)     pre-transposed projection weight
    # add_ref: (S, E)     class/bias + position-embedding additive term
    # out_ref: (1, S, E)
    out_ref[0] = (
        jnp.dot(x_ref[0], wt_ref[...], preferred_element_type=jnp.float32)
        + add_ref[...]
    ).astype(out_ref.dtype)


def _extract_patches(images, patch_size):
    """torch.nn.Unfold(kernel=P, stride=P) followed by transpose(1, 2)."""
    B, C, H, W = images.shape
    P = patch_size
    hp, wp = H // P, W // P
    x = images.reshape(B, C, hp, P, wp, P)
    # -> (B, ph, pw, C, i, j): patch index l = ph*wp + pw, feature = c*P*P + i*P + j
    x = x.transpose(0, 2, 4, 1, 3, 5)
    return x.reshape(B, hp * wp, C * P * P)


@functools.partial(jax.jit, static_argnums=(2,))
def embeddings_set_up(images, params, patch_size):
    B, C, H, W = images.shape
    P = patch_size
    L = (H // P) * (W // P)
    D = C * P * P
    E = params["w"].shape[0]
    S = L + 1

    # ---- layout-only preprocessing (wrapper side) ----
    patches = _extract_patches(images, P)                       # (B, L, D)
    x_ext = jnp.pad(patches, ((0, 0), (1, 0), (0, 0)))          # (B, S, D), row 0 = 0

    # ---- one-time parameter transforms ----
    wt = params["w"].T                                          # (D, E); no in-kernel .T
    add_term = jnp.concatenate(
        [(params["cls"] + params["pos"][0])[None, :],           # class row
         params["b"][None, :] + params["pos"][1:]],             # bias + pos for patches
        axis=0,
    )                                                           # (S, E)

    return pl.pallas_call(
        embed_kernel,
        out_shape=jax.ShapeDtypeStruct((B, S, E), images.dtype),
        grid_spec=pltpu.PrefetchScalarGridSpec(
            num_scalar_prefetch=0,
            grid=(B,),
            in_specs=[
                pl.BlockSpec((1, S, D), lambda b: (b, 0, 0)),   # per-image patches
                pl.BlockSpec((D, E), lambda b: (0, 0)),         # weight (VMEM-resident)
                pl.BlockSpec((S, E), lambda b: (0, 0)),         # additive term (resident)
            ],
            out_specs=pl.BlockSpec((1, S, E), lambda b: (b, 0, 0)),
        ),
        compiler_params=pltpu.CompilerParams(
            dimension_semantics=("parallel",),
        ),
    )(x_ext, wt, add_term)


def reference_forward(images, params, patch_size):
    """Pure-JAX reference mirroring the PyTorch Embeddings_Set_Up.forward."""
    B = images.shape[0]
    E = params["w"].shape[0]
    patches = _extract_patches(images, patch_size)              # unfold().transpose(1,2)
    proj = patches @ params["w"].T + params["b"]                # linear_projection
    cls = jnp.broadcast_to(params["cls"][None, None, :], (B, 1, E))
    emb = jnp.concatenate([cls, proj], axis=1)                  # prepend class token
    return emb + params["pos"][None]                            # add position embeddings


def init_params(key, num_channels, patch_size, latent, num_patches):
    D = num_channels * patch_size * patch_size
    k_w, k_b, k_c, k_p = jax.random.split(key, 4)
    s = 0.1
    return {
        "w": s * jax.random.normal(k_w, (latent, D), jnp.float32),        # Linear weight
        "b": s * jax.random.normal(k_b, (latent,), jnp.float32),          # Linear bias
        "cls": jax.random.normal(k_c, (latent,), jnp.float32),            # class_embedding
        "pos": jax.random.normal(k_p, (num_patches + 1, latent), jnp.float32),
    }


if __name__ == "__main__":
    # Small shapes consistent with the module: 32x32 RGB image, patch 8 -> 16 patches,
    # seq = 17, latent = 128 (lane-dense output).
    B, C, IMG, PATCH, LATENT = 2, 3, 32, 8, 128
    L = (IMG // PATCH) ** 2

    key = jax.random.PRNGKey(0)
    k_x, k_p = jax.random.split(key)
    images = jax.random.normal(k_x, (B, C, IMG, IMG), jnp.float32)
    params = init_params(k_p, C, PATCH, LATENT, L)

    out = embeddings_set_up(images, params, PATCH)
    out = jax.block_until_ready(out)

    ref = reference_forward(images, params, PATCH)
    assert out.shape == (B, L + 1, LATENT)
    assert jnp.allclose(out, ref, rtol=1e-4, atol=1e-4), "mismatch vs JAX reference"

    print("KERNEL_OK")
</pallas_src>

<mosaic_0001>
module attributes {stable_mosaic.version = 11 : i64} {
  func.func @embed_kernel(%arg0: i32, %arg1: memref<1x17x192xf32, #tpu.memory_space<vmem>>, %arg2: memref<192x128xf32, #tpu.memory_space<vmem>>, %arg3: memref<17x128xf32, #tpu.memory_space<vmem>>, %arg4: memref<1x17x128xf32, #tpu.memory_space<vmem>>) attributes {dimension_semantics = [#tpu.dimension_semantics<parallel>], iteration_bounds = array<i64: 2>, scalar_prefetch = 0 : i64, scratch_operands = 0 : i64, tpu.core_type = #tpu.core_type<tc>, window_params = [{transform_indices = @transform_0, window_bounds = array<i64: 1, 17, 192>}, {pipeline_mode = #tpu.pipeline_mode<synchronous>, transform_indices = @transform_1, window_bounds = array<i64: 192, 128>}, {pipeline_mode = #tpu.pipeline_mode<synchronous>, transform_indices = @transform_2, window_bounds = array<i64: 17, 128>}, {transform_indices = @transform_3, window_bounds = array<i64: 1, 17, 128>}]} {
    %c0 = arith.constant 0 : index
    %c0_0 = arith.constant 0 : index
    %c0_1 = arith.constant 0 : index
    %0 = vector.load %arg1[%c0, %c0_0, %c0_1] : memref<1x17x192xf32, #tpu.memory_space<vmem>>, vector<1x17x192xf32>
    %1 = vector.shape_cast %0 : vector<1x17x192xf32> to vector<17x192xf32>
    %c0_2 = arith.constant 0 : index
    %c0_3 = arith.constant 0 : index
    %2 = vector.load %arg2[%c0_2, %c0_3] : memref<192x128xf32, #tpu.memory_space<vmem>>, vector<192x128xf32>
    %cst = arith.constant dense<0.000000e+00> : vector<17x128xf32>
    %3 = tpu.matmul %1, %2, %cst {dimension_numbers = #tpu.dot_dimension_numbers<[1], [0], [0], [1], [0, 0, 1, 1], [], []>} : vector<17x192xf32>, vector<192x128xf32>, vector<17x128xf32> -> vector<17x128xf32>
    %c0_4 = arith.constant 0 : index
    %c0_5 = arith.constant 0 : index
    %4 = vector.load %arg3[%c0_4, %c0_5] : memref<17x128xf32, #tpu.memory_space<vmem>>, vector<17x128xf32>
    %5 = arith.addf %3, %4 : vector<17x128xf32>
    %c0_6 = arith.constant 0 : index
    %c0_7 = arith.constant 0 : index
    %c0_8 = arith.constant 0 : index
    %6 = vector.load %arg4[%c0_6, %c0_7, %c0_8] : memref<1x17x128xf32, #tpu.memory_space<vmem>>, vector<1x17x128xf32>
    %7 = vector.shape_cast %6 : vector<1x17x128xf32> to vector<17x128xf32>
    %8 = vector.shape_cast %5 : vector<17x128xf32> to vector<1x17x128xf32>
    tpu.vector_store %arg4[%c0_6, %c0_7, %c0_8], %8 {strides = array<i32>} : memref<1x17x128xf32, #tpu.memory_space<vmem>>, vector<1x17x128xf32>,
    return
  }
  func.func @transform_0(%arg0: i32) -> (i32, i32, i32) {
    %c0_i32 = arith.constant 0 : i32
    %c0_i32_0 = arith.constant 0 : i32
    %c0_i32_1 = arith.constant 0 : i32
    return %arg0, %c0_i32, %c0_i32_0 : i32, i32, i32
  }
  func.func @transform_1(%arg0: i32) -> (i32, i32) {
    %c0_i32 = arith.constant 0 : i32
    %c0_i32_0 = arith.constant 0 : i32
    %c0_i32_1 = arith.constant 0 : i32
    return %c0_i32, %c0_i32_0 : i32, i32
  }
  func.func @transform_2(%arg0: i32) -> (i32, i32) {
    %c0_i32 = arith.constant 0 : i32
    %c0_i32_0 = arith.constant 0 : i32
    %c0_i32_1 = arith.constant 0 : i32
    return %c0_i32, %c0_i32_0 : i32, i32
  }
  func.func @transform_3(%arg0: i32) -> (i32, i32, i32) {
    %c0_i32 = arith.constant 0 : i32
    %c0_i32_0 = arith.constant 0 : i32
    %c0_i32_1 = arith.constant 0 : i32
    return %arg0, %c0_i32, %c0_i32_0 : i32, i32, i32
  }
}

</mosaic_0001>

<bundles_post_ra>
// kernel: embeddings_set_up.1
= control target key start
LH: loop header
LB: loop body
LE: loop exit
PB: predicated region body
PF: predicated region fallthrough
CT: control target
= control target key end

     0   :  { %s406_s12 = smov 0   ;;  %s525_s0 = inlined_call_operand.vmem [shape: f32[2,17,192], index: 0, kind: input, shape index: {}]   ;;  %s526_s1 = inlined_call_operand.vmem [shape: f32[192,128], index: 1, kind: input, shape index: {}]   ;;  %s527_s2 = inlined_call_operand.vmem [shape: f32[17,128], index: 2, kind: input, shape index: {}]   ;;  %s528_s3 = inlined_call_operand.vmem [shape: f32[2,17,128], index: 3, kind: output, shape index: {}]  }
   0x1 LB: > { %s324_s13 = sadd.s32 4294967295, %s384_s12   ;;  %p328_p0 = scmp.ge.s32.totalorder %s384_s12, 1  ;;  %s384_s12 = sphi %s406_s12, %s13_s12  }
   0x2   : > { %p137_p1 = scmp.lt.s32.totalorder %s384_s12, 3 }
   0x4   : > { %p138_p2 = pnand %p328_p0, %p137_p1 }
   0x5   : > { %p420_p3 = scmp.lt.s32.totalorder (!%p138_p2), %s324_s13, 1 }
   0x6   : > { %141 = sbr.rel (%p138_p2) target bundleno = 182 (0xb6), region = 32 }
   0xb   : > { %v192_v0 = vld [vmem:[%s526_s1 + $0x78] sm:$0xff]  ;;  %v191_v1 = vld [vmem:[%s526_s1 + $0x70] sm:$0xff]  ;;  %v190_v3 = vld [vmem:[%s526_s1 + $0x68] sm:$0xff]  ;;  %s531_s13 = smov (!%p420_p3, %s324_s13), 1  ;;  %vm204_vm0 = vcmask 523264  }
   0xc   : > { %214 = vmatpush.msra.mxu0 %v192_v0  ;;  %336 = vmatpush.msra.mxu2 %v192_v0  ;;  %v200_v2 = vld [vmem:[%s526_s1 + $0xb8] sm:$0xff]  ;;  %v199_v4 = vld [vmem:[%s526_s1 + $0xb0] sm:$0xff]  ;;  %v198_v5 = vld [vmem:[%s526_s1 + $0xa8] sm:$0xff]  ;;  %s368_s10 = smul.u32 48, %s531_s13 }
   0xd   : > { %337 = vmatpush.msra.mxu3 %v192_v0  ;;  %248 = vmatpush.msra.mxu1 %v200_v2  ;;  %v189_v6 = vld [vmem:[%s526_s1 + $0x60] sm:$0xff]  ;;  %v188_v8 = vld [vmem:[%s526_s1 + $0x58] sm:$0xff]  ;;  %v187_v10 = vld [vmem:[%s526_s1 + $0x50] sm:$0xff]  ;;  %s369_s17 = smul.u32 24, %s531_s13 }
   0xe   : > { %215 = vmatpush.msra.mxu0 %v191_v1  ;;  %338 = vmatpush.msra.mxu2 %v191_v1  ;;  %v197_v7 = vld [vmem:[%s526_s1 + $0xa0] sm:$0xff]  ;;  %v196_v9 = vld [vmem:[%s526_s1 + $0x98] sm:$0xff]  ;;  %v195_v11 = vld [vmem:[%s526_s1 + $0x90] sm:$0xff]  ;;  %s471_s23 = scalar_lea.vmem %s525_s0, %s368_s10 }
   0xf   : > { %339 = vmatpush.msra.mxu3 %v191_v1  ;;  %249 = vmatpush.msra.mxu1 %v199_v4  ;;  %v186_v12 = vld [vmem:[%s526_s1 + $0x48] sm:$0xff]  ;;  %v185_v14 = vld [vmem:[%s526_s1 + $0x40] sm:$0xff]  ;;  %v184_v16 = vld [vmem:[%s526_s1 + $0x38] sm:$0xff]  ;;  %s170_s22 = scalar_lea.vmem %s528_s3, %s369_s17 }
  0x10   : > { %216 = vmatpush.msra.mxu0 %v190_v3  ;;  %340 = vmatpush.msra.mxu2 %v190_v3  ;;  %v194_v13 = vld [vmem:[%s526_s1 + $0x88] sm:$0xff]  ;;  %v193_v15 = vld [vmem:[%s526_s1 + $0x80] sm:$0xff]  ;;  %v183_v18 = vld [vmem:[%s526_s1 + $0x30] sm:$0xff] }
  0x11   : > { %341 = vmatpush.msra.mxu3 %v190_v3  ;;  %250 = vmatpush.msra.mxu1 %v198_v5  ;;  %v172_v17 = vld [vmem:[%s471_s23 + $0x8] sm:$0xff]  ;;  %v181_v20 = vld [vmem:[%s526_s1 + $0x20] sm:$0xff]  ;;  %v180_v21 = vld [vmem:[%s526_s1 + $0x18] sm:$0xff] }
  0x12   : > { %217 = vmatpush.msra.mxu0 %v189_v6  ;;  %342 = vmatpush.msra.mxu2 %v189_v6  ;;  %v182_v19 = vld [vmem:[%s526_s1 + $0x28] sm:$0xff]  ;;  %v174_v22 = vld [vmem:[%s471_s23 + $0x18] sm:$0xff]  ;;  %v179_v23 = vld [vmem:[%s526_s1 + $0x10] sm:$0xff] }
  0x13   : > { %343 = vmatpush.msra.mxu3 %v189_v6  ;;  %251 = vmatpush.msra.mxu1 %v197_v7  ;;  %v178_v24 = vld [vmem:[%s526_s1 + $0x8] sm:$0xff]  ;;  %v177_v25 = vld [vmem:[%s526_s1] sm:$0xff]  ;;  %v173_v27 = vld [vmem:[%s471_s23 + $0x10] sm:$0xff] }
  0x14   : > { %218 = vmatpush.msra.mxu0 %v188_v8  ;;  %344 = vmatpush.msra.mxu2 %v188_v8  ;;  %v171_v26 = vld [vmem:[%s471_s23] sm:$0xff]  ;;  %v176_v29 = vld [vmem:[%s471_s23 + $0x28] sm:$0x1]  ;;  %v203_v37 = vld [vmem:[%s527_s2 + $0x10] sm:$0x1] }
  0x15   : > { %345 = vmatpush.msra.mxu3 %v188_v8  ;;  %252 = vmatpush.msra.mxu1 %v196_v9  ;;  %v175_v28 = vld [vmem:[%s471_s23 + $0x20] sm:$0x1]  ;;  %v202_v36 = vld [vmem:[%s527_s2 + $0x8] sm:$0xff] }
  0x16   : > { %219 = vmatpush.msra.mxu0 %v187_v10  ;;  %346 = vmatpush.msra.mxu2 %v187_v10  ;;  %v201_v32 = vld [vmem:[%s527_s2] sm:$0xff] }
  0x17   : > { %347 = vmatpush.msra.mxu3 %v187_v10  ;;  %253 = vmatpush.msra.mxu1 %v195_v11 }
  0x18   : > { %220 = vmatpush.msra.mxu0 %v186_v12  ;;  %348 = vmatpush.msra.mxu2 %v186_v12 }
  0x19   : > { %349 = vmatpush.msra.mxu3 %v186_v12  ;;  %254 = vmatpush.msra.mxu1 %v194_v13 }
  0x1a   : > { %221 = vmatpush.msra.mxu0 %v185_v14  ;;  %350 = vmatpush.msra.mxu2 %v185_v14 }
  0x1b   : > { %351 = vmatpush.msra.mxu3 %v185_v14  ;;  %255 = vmatpush.msra.mxu1 %v193_v15 }
  0x1c   : > { %222 = vmatpush.msra.mxu0 %v184_v16  ;;  %352 = vmatpush.msra.mxu2 %v184_v16 }
  0x1d   : > { %353 = vmatpush.msra.mxu3 %v184_v16  ;;  %331 = vmatmul.msk.f32.vlgmr.msra.gmra.mxu1 %vm204_vm0, %v172_v17 }
  0x1e   : > { %223 = vmatpush.msra.mxu0 %v183_v18  ;;  %354 = vmatpush.msra.mxu2 %v183_v18 }
  0x1f   : > { %355 = vmatpush.msra.mxu3 %v183_v18 }
  0x20   : > { %224 = vmatpush.msra.mxu0 %v182_v19  ;;  %356 = vmatpush.msra.mxu2 %v182_v19 }
  0x21   : > { %357 = vmatpush.msra.mxu3 %v182_v19 }
  0x22   : > { %225 = vmatpush.msra.mxu0 %v181_v20  ;;  %358 = vmatpush.msra.mxu2 %v181_v20 }
  0x23   : > { %359 = vmatpush.msra.mxu3 %v181_v20 }
  0x24   : > { %226 = vmatpush.msra.mxu0 %v180_v21  ;;  %360 = vmatpush.msra.mxu2 %v180_v21 }
  0x25   : > { %361 = vmatpush.msra.mxu3 %v180_v21  ;;  %332 = vmatmul.msk.f32.gmra.mxu1 %vm204_vm0, %v174_v22 }
  0x26   : > { %227 = vmatpush.msra.mxu0 %v179_v23  ;;  %362 = vmatpush.msra.mxu2 %v179_v23 }
  0x27   : > { %363 = vmatpush.msra.mxu3 %v179_v23 }
  0x28   : > { %228 = vmatpush.msra.mxu0 %v178_v24  ;;  %364 = vmatpush.msra.mxu2 %v178_v24 }
  0x29   : > { %365 = vmatpush.msra.mxu3 %v178_v24 }
  0x2a   : > { %229 = vmatpush.msra.mxu0 %v177_v25  ;;  %366 = vmatpush.msra.mxu2 %v177_v25 }
  0x2b   : > { %367 = vmatpush.msra.mxu3 %v177_v25  ;;  %230 = vmatmul.f32.vlgmr.msra.gmra.mxu0 %v171_v26 }
  0x2c   : > { %233 = vmatmul.f32.vlgmr.msra.gmra.mxu2 %v173_v27  ;;  %236 = vmatmul.f32.vlgmr.msra.gmra.mxu3 %v175_v28 }
  0x2d   : > { %333 = vmatmul.msk.f32.gmra.mxu1 %vm204_vm0, %v176_v29 }
  0x9a   : > { %v257_v30 = vpop.f32.mrf.mxu1 }
  0xa2   : > { %v260_v31 = vpop.f32.mrf.mxu1 }
  0xa8   : > { %v231_v33 = vpop.f32.mrf.mxu0 }
  0xa9   : > { %v232_v34 = vadd.f32 %v231_v33, %v201_v32 }
  0xaa   : > { %v263_v38 = vpop.f32.mrf.mxu1 }
  0xab   : > { %v258_v35 = vadd.f32 %v257_v30, %v232_v34 }
  0xad   : > { %266 = vst [vmem:[%s170_s22] sm:$0xff] %v258_v35 }
  0xaf   : > { %v234_v39 = vpop.f32.mrf.mxu2  ;;  %v237_v40 = vpop.f32.mrf.mxu3 }
  0xb0   : > { %v235_v41 = vadd.f32 %v234_v39, %v202_v36  ;;  %v238_v42 = vadd.f32 %v237_v40, %v203_v37 }
  0xb2   : > { %v261_v43 = vadd.f32 %v260_v31, %v235_v41  ;;  %v264_v44 = vadd.f32 %v263_v38, %v238_v42 }
  0xb4   : > { %267 = vst [vmem:[%s170_s22 + $0x8] sm:$0xff] %v261_v43 }
  0xb5   : > { %268 = vst [vmem:[%s170_s22 + $0x10] sm:$0x1] %v264_v44 }
  0xb6 PF: > { %s13_s12 = sadd.s32 1, %s384_s12  }
  0xb7   : > { %p10_p4 = scmp.ge.s32.totalorder %s13_s12, 4  }
  0xb9   :  { %12 = sbr.rel (!%p10_p4) target bundleno = 1 (0x1), region = 62 }

</bundles_post_ra>
